<compile_context>
chip_gen: v5e
topology: v5e:2x2
jax: 0.10.0
libtpu: 0.0.40
codegen_flags: <defaults>
</compile_context>

<pallas_src>
import jax
import jax.numpy as jnp
from jax.experimental import pallas as pl
from jax.experimental.pallas import tpu as pltpu


def resnet_relu_kernel(x_ref, w_ref, b_ref, wout_ref, out_ref):
    # x_ref    : (dim, block_n)  batch on lanes
    # w_ref    : (6, m, m)       w_ref[0] is fc1 zero-padded to m columns
    # b_ref    : (6, m, 1)
    # wout_ref : (m, 1)
    # out_ref  : (1, block_n)
    dim, bn = x_ref.shape
    m = w_ref.shape[1]

    # Process the tile in (<=2) independent 256-lane chunks (statically
    # unrolled).  The chunks' MXU->VPU dependency chains are independent, so
    # the scheduler can interleave them and hide the tiny-matmul latency.
    chunk = 256 if bn >= 512 else bn
    for c0 in range(0, bn, chunk):
        xs = [x_ref[d:d + 1, c0:c0 + chunk] for d in range(dim)]   # (1, chunk) rows

        # fc1 (K = dim = 2): broadcast FMAs on the VPU (an MXU pass would be
        # pure waste); bias folded into the first multiply-add.
        w1 = w_ref[0]                                   # (m, m); cols >= dim are zeros
        y = w1[:, 0:1] * xs[0] + b_ref[0]
        for d in range(1, dim):
            y = y + w1[:, d:d + 1] * xs[d]
        y = jnp.maximum(y, 0.0)                         # degree == 1

        # s = x @ Ix.  Ix only sets (0,0) and (1,1), so s is x0/x1 embedded in
        # feature rows 0/1: one fused select, no zeros buffer.
        row = jax.lax.broadcasted_iota(jnp.int32, (m, chunk), 0)
        s = jnp.where(row == 0, xs[0], jnp.where(row == 1, xs[1], 0.0))

        # residual block 1 (fc2)
        y = jnp.maximum(jnp.dot(w_ref[1], y, preferred_element_type=jnp.float32)
                        + b_ref[1], 0.0)
        y = y + s
        s = y
        # residual block 2 (fc3, fc4)
        y = jnp.maximum(jnp.dot(w_ref[2], y, preferred_element_type=jnp.float32)
                        + b_ref[2], 0.0)
        y = jnp.maximum(jnp.dot(w_ref[3], y, preferred_element_type=jnp.float32)
                        + b_ref[3], 0.0)
        y = y + s
        s = y
        # residual block 3 (fc5, fc6)
        y = jnp.maximum(jnp.dot(w_ref[4], y, preferred_element_type=jnp.float32)
                        + b_ref[4], 0.0)
        y = jnp.maximum(jnp.dot(w_ref[5], y, preferred_element_type=jnp.float32)
                        + b_ref[5], 0.0)
        y = y + s

        # outlayer (m -> 1, no bias): sublane reduction, lane-dense store.
        out_ref[:, c0:c0 + chunk] = jnp.sum(y * wout_ref[...], axis=0, keepdims=True)


def _full(arr):
    nd = arr.ndim
    return pl.BlockSpec(arr.shape, lambda i, _nd=nd: (0,) * _nd)


@jax.jit
def resnet_relu_forward(x, w_stack, b_stack, wout):
    """Pallas forward for boundary_control_type == 'none' (returns shape (N,))."""
    N, dim = x.shape

    # Tile heuristic: block_n in {128, 256, 512} (vreg pressure caps it at 512),
    # multiple of 128, and >=2 grid tiles whenever N > 128 so ("parallel",) can
    # shard across both v7x TensorCores (no-op on single-TC v5e/v6e).
    groups = pl.cdiv(N, 128)
    per_tile = 4 if groups >= 8 else (2 if groups >= 3 else 1)
    block_n = 128 * per_tile
    n_tiles = max(1, pl.cdiv(groups, per_tile))
    n_pad = n_tiles * block_n

    # Batch-on-lanes input; zero-pad ragged batch (padded cols are sliced off).
    # Inside this jit the transpose+pad is a single small fusion compiled
    # together with the pallas_call (one dispatch).
    xT = jnp.zeros((dim, n_pad), jnp.float32).at[:, :N].set(x.T.astype(jnp.float32))

    out = pl.pallas_call(
        resnet_relu_kernel,
        out_shape=jax.ShapeDtypeStruct((1, n_pad), jnp.float32),
        grid=(n_tiles,),
        in_specs=[
            pl.BlockSpec((dim, block_n), lambda i: (0, i)),   # x tile (lanes = batch)
            _full(w_stack),                                   # (6, m, m) resident
            _full(b_stack),                                   # (6, m, 1) resident
            _full(wout),                                      # (m, 1)    resident
        ],
        out_specs=pl.BlockSpec((1, block_n), lambda i: (0, i)),   # lane-dense output
        compiler_params=pltpu.CompilerParams(dimension_semantics=("parallel",)),
    )(xT, w_stack, b_stack, wout)

    return out[0, :N]


def pack_params(p):
    """Pack the 13 per-layer tensors into 3 kernel operands (done once)."""
    m, dim = p["w1"].shape
    w1p = jnp.zeros((m, m), jnp.float32).at[:, :dim].set(p["w1"].astype(jnp.float32))
    w_stack = jnp.stack([w1p, p["w2"], p["w3"], p["w4"], p["w5"], p["w6"]]
                        ).astype(jnp.float32)                 # (6, m, m)
    b_stack = jnp.stack([p["b1"], p["b2"], p["b3"], p["b4"], p["b5"], p["b6"]]
                        ).astype(jnp.float32)                 # (6, m, 1)
    return w_stack, b_stack, p["wout"].astype(jnp.float32)


def ref_forward(x, p):
    """Pure-JAX reference matching the PyTorch forward (degree=1, 'none')."""
    m = p["w1"].shape[0]
    dim = x.shape[1]
    Ix = jnp.zeros((dim, m), jnp.float32).at[0, 0].set(1.0).at[1, 1].set(1.0)
    s = x @ Ix
    y = jnp.maximum(x @ p["w1"].T + p["b1"][:, 0], 0.0)
    y = jnp.maximum(y @ p["w2"].T + p["b2"][:, 0], 0.0)
    y = y + s
    s = y
    y = jnp.maximum(y @ p["w3"].T + p["b3"][:, 0], 0.0)
    y = jnp.maximum(y @ p["w4"].T + p["b4"][:, 0], 0.0)
    y = y + s
    s = y
    y = jnp.maximum(y @ p["w5"].T + p["b5"][:, 0], 0.0)
    y = jnp.maximum(y @ p["w6"].T + p["b6"][:, 0], 0.0)
    y = y + s
    return (y @ p["wout"])[:, 0]


def init_params(key, dim, m):
    """Deterministic init mimicking torch.nn.Linear (uniform +/- 1/sqrt(fan_in)).
    Weights kept in PyTorch (out_features, in_features) layout; biases as (out, 1);
    outlayer weight stored as an (m, 1) column for the in-kernel lane broadcast."""
    ks = jax.random.split(key, 13)

    def linear(kw, kb, fan_in, fan_out, bias=True):
        bound = 1.0 / (fan_in ** 0.5)
        w = jax.random.uniform(kw, (fan_out, fan_in), jnp.float32, -bound, bound)
        b = (jax.random.uniform(kb, (fan_out, 1), jnp.float32, -bound, bound)
             if bias else None)
        return w, b

    w1, b1 = linear(ks[0], ks[1], dim, m)
    w2, b2 = linear(ks[2], ks[3], m, m)
    w3, b3 = linear(ks[4], ks[5], m, m)
    w4, b4 = linear(ks[6], ks[7], m, m)
    w5, b5 = linear(ks[8], ks[9], m, m)
    w6, b6 = linear(ks[10], ks[11], m, m)
    wout, _ = linear(ks[12], ks[12], m, 1, bias=False)
    wout = wout.reshape(m, 1)

    return {"w1": w1, "b1": b1, "w2": w2, "b2": b2,
            "w3": w3, "b3": b3, "w4": w4, "b4": b4,
            "w5": w5, "b5": b5, "w6": w6, "b6": b6,
            "wout": wout}


if __name__ == "__main__":
    key = jax.random.PRNGKey(0)
    k_x, k_p = jax.random.split(key)

    dim, m = 2, 32
    params = init_params(k_p, dim, m)
    w_stack, b_stack, wout = pack_params(params)

    # N=256 exercises the 2x128-lane-tile path; N=1000 exercises ragged padding,
    # block_n=512 tiles and the 2x256-lane intra-tile chunk interleave.
    for n in (256, 1000):
        x = jax.random.normal(jax.random.fold_in(k_x, n), (n, dim), jnp.float32)
        y_kernel = jax.block_until_ready(resnet_relu_forward(x, w_stack, b_stack, wout))
        y_ref = jax.block_until_ready(ref_forward(x, params))
        assert y_kernel.shape == (n,)
        err = float(jnp.max(jnp.abs(y_kernel - y_ref)))
        assert err < 1e-4, f"N={n}: mismatch vs reference: {err}"

    print("KERNEL_OK")
</pallas_src>

<mosaic_0001>
module attributes {stable_mosaic.version = 11 : i64} {
  func.func @resnet_relu_kernel(%arg0: i32, %arg1: memref<2x128xf32, #tpu.memory_space<vmem>>, %arg2: memref<6x32x32xf32, #tpu.memory_space<vmem>>, %arg3: memref<6x32x1xf32, #tpu.memory_space<vmem>>, %arg4: memref<32x1xf32, #tpu.memory_space<vmem>>, %arg5: memref<1x128xf32, #tpu.memory_space<vmem>>) attributes {dimension_semantics = [#tpu.dimension_semantics<parallel>], iteration_bounds = array<i64: 2>, scalar_prefetch = 0 : i64, scratch_operands = 0 : i64, tpu.core_type = #tpu.core_type<tc>, window_params = [{transform_indices = @transform_0, window_bounds = array<i64: 2, 128>}, {pipeline_mode = #tpu.pipeline_mode<synchronous>, transform_indices = @transform_1, window_bounds = array<i64: 6, 32, 32>}, {pipeline_mode = #tpu.pipeline_mode<synchronous>, transform_indices = @transform_2, window_bounds = array<i64: 6, 32, 1>}, {pipeline_mode = #tpu.pipeline_mode<synchronous>, transform_indices = @transform_3, window_bounds = array<i64: 32, 1>}, {transform_indices = @transform_4, window_bounds = array<i64: 1, 128>}]} {
    %c0 = arith.constant 0 : index
    %c0_0 = arith.constant 0 : index
    %0 = vector.load %arg1[%c0, %c0_0] : memref<2x128xf32, #tpu.memory_space<vmem>>, vector<1x128xf32>
    %c1 = arith.constant 1 : index
    %c0_1 = arith.constant 0 : index
    %1 = vector.load %arg1[%c1, %c0_1] : memref<2x128xf32, #tpu.memory_space<vmem>>, vector<1x128xf32>
    %c0_2 = arith.constant 0 : index
    %c0_3 = arith.constant 0 : index
    %c0_4 = arith.constant 0 : index
    %2 = vector.load %arg2[%c0_2, %c0_3, %c0_4] : memref<6x32x32xf32, #tpu.memory_space<vmem>>, vector<1x32x32xf32>
    %3 = vector.shape_cast %2 : vector<1x32x32xf32> to vector<32x32xf32>
    %4 = vector.extract_strided_slice %3 {offsets = [0, 0], sizes = [32, 1], strides = [1, 1]} : vector<32x32xf32> to vector<32x1xf32>
    %5 = vector.broadcast %4 : vector<32x1xf32> to vector<32x128xf32>
    %6 = vector.broadcast %0 : vector<1x128xf32> to vector<32x128xf32>
    %7 = arith.mulf %5, %6 : vector<32x128xf32>
    %c0_5 = arith.constant 0 : index
    %c0_6 = arith.constant 0 : index
    %c0_7 = arith.constant 0 : index
    %8 = vector.load %arg3[%c0_5, %c0_6, %c0_7] : memref<6x32x1xf32, #tpu.memory_space<vmem>>, vector<1x32x1xf32>
    %9 = vector.shape_cast %8 : vector<1x32x1xf32> to vector<32x1xf32>
    %10 = vector.broadcast %9 : vector<32x1xf32> to vector<32x128xf32>
    %11 = arith.addf %7, %10 : vector<32x128xf32>
    %12 = vector.extract_strided_slice %3 {offsets = [0, 1], sizes = [32, 1], strides = [1, 1]} : vector<32x32xf32> to vector<32x1xf32>
    %13 = vector.broadcast %12 : vector<32x1xf32> to vector<32x128xf32>
    %14 = vector.broadcast %1 : vector<1x128xf32> to vector<32x128xf32>
    %15 = arith.mulf %13, %14 : vector<32x128xf32>
    %16 = arith.addf %11, %15 : vector<32x128xf32>
    %cst = arith.constant 0.000000e+00 : f32
    %17 = vector.broadcast %cst : f32 to vector<32x128xf32>
    %18 = arith.maximumf %16, %17 : vector<32x128xf32>
    %19 = tpu.iota {dimensions = array<i32: 0>} : vector<32x128xi32>
    %c0_i32 = arith.constant 0 : i32
    %20 = vector.broadcast %c0_i32 : i32 to vector<32x128xi32>
    %21 = arith.cmpi eq, %19, %20 : vector<32x128xi32>
    %c1_i32 = arith.constant 1 : i32
    %22 = vector.broadcast %c1_i32 : i32 to vector<32x128xi32>
    %23 = arith.cmpi eq, %19, %22 : vector<32x128xi32>
    %cst_8 = arith.constant 0.000000e+00 : f32
    %24 = vector.shape_cast %1 : vector<1x128xf32> to vector<1x128xf32>
    %25 = vector.broadcast %24 : vector<1x128xf32> to vector<32x128xf32>
    %26 = vector.broadcast %cst_8 : f32 to vector<32x128xf32>
    %27 = arith.select %23, %25, %26 : vector<32x128xi1>, vector<32x128xf32>
    %28 = vector.shape_cast %0 : vector<1x128xf32> to vector<1x128xf32>
    %29 = vector.broadcast %28 : vector<1x128xf32> to vector<32x128xf32>
    %30 = arith.select %21, %29, %27 : vector<32x128xi1>, vector<32x128xf32>
    %c1_9 = arith.constant 1 : index
    %c0_10 = arith.constant 0 : index
    %c0_11 = arith.constant 0 : index
    %31 = vector.load %arg2[%c1_9, %c0_10, %c0_11] : memref<6x32x32xf32, #tpu.memory_space<vmem>>, vector<1x32x32xf32>
    %32 = vector.shape_cast %31 : vector<1x32x32xf32> to vector<32x32xf32>
    %cst_12 = arith.constant dense<0.000000e+00> : vector<32x128xf32>
    %33 = tpu.matmul %32, %18, %cst_12 {dimension_numbers = #tpu.dot_dimension_numbers<[1], [0], [0], [1], [0, 0, 1, 1], [], []>} : vector<32x32xf32>, vector<32x128xf32>, vector<32x128xf32> -> vector<32x128xf32>
    %c1_13 = arith.constant 1 : index
    %c0_14 = arith.constant 0 : index
    %c0_15 = arith.constant 0 : index
    %34 = vector.load %arg3[%c1_13, %c0_14, %c0_15] : memref<6x32x1xf32, #tpu.memory_space<vmem>>, vector<1x32x1xf32>
    %35 = vector.shape_cast %34 : vector<1x32x1xf32> to vector<32x1xf32>
    %36 = vector.broadcast %35 : vector<32x1xf32> to vector<32x128xf32>
    %37 = arith.addf %33, %36 : vector<32x128xf32>
    %cst_16 = arith.constant 0.000000e+00 : f32
    %38 = vector.broadcast %cst_16 : f32 to vector<32x128xf32>
    %39 = arith.maximumf %37, %38 : vector<32x128xf32>
    %40 = arith.addf %39, %30 : vector<32x128xf32>
    %c2 = arith.constant 2 : index
    %c0_17 = arith.constant 0 : index
    %c0_18 = arith.constant 0 : index
    %41 = vector.load %arg2[%c2, %c0_17, %c0_18] : memref<6x32x32xf32, #tpu.memory_space<vmem>>, vector<1x32x32xf32>
    %42 = vector.shape_cast %41 : vector<1x32x32xf32> to vector<32x32xf32>
    %cst_19 = arith.constant dense<0.000000e+00> : vector<32x128xf32>
    %43 = tpu.matmul %42, %40, %cst_19 {dimension_numbers = #tpu.dot_dimension_numbers<[1], [0], [0], [1], [0, 0, 1, 1], [], []>} : vector<32x32xf32>, vector<32x128xf32>, vector<32x128xf32> -> vector<32x128xf32>
    %c2_20 = arith.constant 2 : index
    %c0_21 = arith.constant 0 : index
    %c0_22 = arith.constant 0 : index
    %44 = vector.load %arg3[%c2_20, %c0_21, %c0_22] : memref<6x32x1xf32, #tpu.memory_space<vmem>>, vector<1x32x1xf32>
    %45 = vector.shape_cast %44 : vector<1x32x1xf32> to vector<32x1xf32>
    %46 = vector.broadcast %45 : vector<32x1xf32> to vector<32x128xf32>
    %47 = arith.addf %43, %46 : vector<32x128xf32>
    %cst_23 = arith.constant 0.000000e+00 : f32
    %48 = vector.broadcast %cst_23 : f32 to vector<32x128xf32>
    %49 = arith.maximumf %47, %48 : vector<32x128xf32>
    %c3 = arith.constant 3 : index
    %c0_24 = arith.constant 0 : index
    %c0_25 = arith.constant 0 : index
    %50 = vector.load %arg2[%c3, %c0_24, %c0_25] : memref<6x32x32xf32, #tpu.memory_space<vmem>>, vector<1x32x32xf32>
    %51 = vector.shape_cast %50 : vector<1x32x32xf32> to vector<32x32xf32>
    %cst_26 = arith.constant dense<0.000000e+00> : vector<32x128xf32>
    %52 = tpu.matmul %51, %49, %cst_26 {dimension_numbers = #tpu.dot_dimension_numbers<[1], [0], [0], [1], [0, 0, 1, 1], [], []>} : vector<32x32xf32>, vector<32x128xf32>, vector<32x128xf32> -> vector<32x128xf32>
    %c3_27 = arith.constant 3 : index
    %c0_28 = arith.constant 0 : index
    %c0_29 = arith.constant 0 : index
    %53 = vector.load %arg3[%c3_27, %c0_28, %c0_29] : memref<6x32x1xf32, #tpu.memory_space<vmem>>, vector<1x32x1xf32>
    %54 = vector.shape_cast %53 : vector<1x32x1xf32> to vector<32x1xf32>
    %55 = vector.broadcast %54 : vector<32x1xf32> to vector<32x128xf32>
    %56 = arith.addf %52, %55 : vector<32x128xf32>
    %cst_30 = arith.constant 0.000000e+00 : f32
    %57 = vector.broadcast %cst_30 : f32 to vector<32x128xf32>
    %58 = arith.maximumf %56, %57 : vector<32x128xf32>
    %59 = arith.addf %58, %40 : vector<32x128xf32>
    %c4 = arith.constant 4 : index
    %c0_31 = arith.constant 0 : index
    %c0_32 = arith.constant 0 : index
    %60 = vector.load %arg2[%c4, %c0_31, %c0_32] : memref<6x32x32xf32, #tpu.memory_space<vmem>>, vector<1x32x32xf32>
    %61 = vector.shape_cast %60 : vector<1x32x32xf32> to vector<32x32xf32>
    %cst_33 = arith.constant dense<0.000000e+00> : vector<32x128xf32>
    %62 = tpu.matmul %61, %59, %cst_33 {dimension_numbers = #tpu.dot_dimension_numbers<[1], [0], [0], [1], [0, 0, 1, 1], [], []>} : vector<32x32xf32>, vector<32x128xf32>, vector<32x128xf32> -> vector<32x128xf32>
    %c4_34 = arith.constant 4 : index
    %c0_35 = arith.constant 0 : index
    %c0_36 = arith.constant 0 : index
    %63 = vector.load %arg3[%c4_34, %c0_35, %c0_36] : memref<6x32x1xf32, #tpu.memory_space<vmem>>, vector<1x32x1xf32>
    %64 = vector.shape_cast %63 : vector<1x32x1xf32> to vector<32x1xf32>
    %65 = vector.broadcast %64 : vector<32x1xf32> to vector<32x128xf32>
    %66 = arith.addf %62, %65 : vector<32x128xf32>
    %cst_37 = arith.constant 0.000000e+00 : f32
    %67 = vector.broadcast %cst_37 : f32 to vector<32x128xf32>
    %68 = arith.maximumf %66, %67 : vector<32x128xf32>
    %c5 = arith.constant 5 : index
    %c0_38 = arith.constant 0 : index
    %c0_39 = arith.constant 0 : index
    %69 = vector.load %arg2[%c5, %c0_38, %c0_39] : memref<6x32x32xf32, #tpu.memory_space<vmem>>, vector<1x32x32xf32>
    %70 = vector.shape_cast %69 : vector<1x32x32xf32> to vector<32x32xf32>
    %cst_40 = arith.constant dense<0.000000e+00> : vector<32x128xf32>
    %71 = tpu.matmul %70, %68, %cst_40 {dimension_numbers = #tpu.dot_dimension_numbers<[1], [0], [0], [1], [0, 0, 1, 1], [], []>} : vector<32x32xf32>, vector<32x128xf32>, vector<32x128xf32> -> vector<32x128xf32>
    %c5_41 = arith.constant 5 : index
    %c0_42 = arith.constant 0 : index
    %c0_43 = arith.constant 0 : index
    %72 = vector.load %arg3[%c5_41, %c0_42, %c0_43] : memref<6x32x1xf32, #tpu.memory_space<vmem>>, vector<1x32x1xf32>
    %73 = vector.shape_cast %72 : vector<1x32x1xf32> to vector<32x1xf32>
    %74 = vector.broadcast %73 : vector<32x1xf32> to vector<32x128xf32>
    %75 = arith.addf %71, %74 : vector<32x128xf32>
    %cst_44 = arith.constant 0.000000e+00 : f32
    %76 = vector.broadcast %cst_44 : f32 to vector<32x128xf32>
    %77 = arith.maximumf %75, %76 : vector<32x128xf32>
    %78 = arith.addf %77, %59 : vector<32x128xf32>
    %c0_45 = arith.constant 0 : index
    %c0_46 = arith.constant 0 : index
    %79 = vector.load %arg4[%c0_45, %c0_46] : memref<32x1xf32, #tpu.memory_space<vmem>>, vector<32x1xf32>
    %80 = vector.broadcast %79 : vector<32x1xf32> to vector<32x128xf32>
    %81 = arith.mulf %78, %80 : vector<32x128xf32>
    %cst_47 = arith.constant dense<0.000000e+00> : vector<128xf32>
    %82 = vector.multi_reduction <add>, %81, %cst_47 [0] : vector<32x128xf32> to vector<128xf32>
    %83 = vector.shape_cast %82 : vector<128xf32> to vector<1x128xf32>
    %c0_48 = arith.constant 0 : index
    %c0_49 = arith.constant 0 : index
    %84 = vector.load %arg5[%c0_48, %c0_49] : memref<1x128xf32, #tpu.memory_space<vmem>>, vector<1x128xf32>
    tpu.vector_store %arg5[%c0_48, %c0_49], %83 {strides = array<i32>} : memref<1x128xf32, #tpu.memory_space<vmem>>, vector<1x128xf32>,
    return
  }
  func.func @transform_0(%arg0: i32) -> (i32, i32) {
    %c0_i32 = arith.constant 0 : i32
    %c0_i32_0 = arith.constant 0 : i32
    return %c0_i32, %arg0 : i32, i32
  }
  func.func @transform_1(%arg0: i32) -> (i32, i32, i32) {
    %c0_i32 = arith.constant 0 : i32
    %c0_i32_0 = arith.constant 0 : i32
    %c0_i32_1 = arith.constant 0 : i32
    %c0_i32_2 = arith.constant 0 : i32
    return %c0_i32, %c0_i32_0, %c0_i32_1 : i32, i32, i32
  }
  func.func @transform_2(%arg0: i32) -> (i32, i32, i32) {
    %c0_i32 = arith.constant 0 : i32
    %c0_i32_0 = arith.constant 0 : i32
    %c0_i32_1 = arith.constant 0 : i32
    %c0_i32_2 = arith.constant 0 : i32
    return %c0_i32, %c0_i32_0, %c0_i32_1 : i32, i32, i32
  }
  func.func @transform_3(%arg0: i32) -> (i32, i32) {
    %c0_i32 = arith.constant 0 : i32
    %c0_i32_0 = arith.constant 0 : i32
    %c0_i32_1 = arith.constant 0 : i32
    return %c0_i32, %c0_i32_0 : i32, i32
  }
  func.func @transform_4(%arg0: i32) -> (i32, i32) {
    %c0_i32 = arith.constant 0 : i32
    %c0_i32_0 = arith.constant 0 : i32
    return %c0_i32, %arg0 : i32, i32
  }
}

</mosaic_0001>

<bundles_post_ra>
// kernel: resnet_relu_forward.1
= control target key start
LH: loop header
LB: loop body
LE: loop exit
PB: predicated region body
PF: predicated region fallthrough
CT: control target
= control target key end

     0   :  { %9 = vsyncpa [#allocation3], 0  ;;  %s1309_s0 = inlined_call_operand.vmem [shape: f32[2,256], index: 0, kind: input, shape index: {}]   ;;  %s1310_s1 = inlined_call_operand.vmem [shape: f32[6,32,32], index: 1, kind: input, shape index: {}]   ;;  %s1311_s2 = inlined_call_operand.vmem [shape: f32[6,32,1], index: 2, kind: input, shape index: {}]   ;;  %s1312_s3 = inlined_call_operand.vmem [shape: f32[32,1], index: 3, kind: input, shape index: {}]   ;;  %s1313_s4 = inlined_call_operand.hbm [shape: f32[1,256], index: 4, kind: output, shape index: {}]  }
   0x1   :  { %11 = vsyncpa [#allocation3 + $0x1], 0  ;;  %s1017_s15 = smov 0   ;;  %s1019_s16 = smov 0  }
   0x2   :  { %s1021_s17 = smov 0   ;;  %s1023_s18 = smov 0  }
   0x3 LB: > { %s1038_s19 = sadd.s32 4294967295, %s988_s18   ;;  %s795_s20 = sadd.s32 4294967294, %s988_s18   ;;  %s988_s18 = sphi %s1023_s18, %s1319_s18   ;;  %s984_s17 = sphi %s1021_s17, %s1318_s17   ;;  %s980_s16 = sphi %s1019_s16, %s1317_s16   ;;  %s976_s15 = sphi %s1017_s15, %s1316_s15  }
   0x4   : > { %s1042_s21 = sadd.s32 1, %s988_s18   ;;  %s113_s22 = sadd.s32 1, %s984_s17 }
   0x5   : > { %s110_s23 = ssub.s32 %s988_s18, %s1042_s21  ;;  %p123_p0 = scmp.ne.s32.totalorder %s984_s17, %s980_s16 }
   0x6   : > { %p111_p1 = scmp.eq.s32.totalorder %s110_s23, 0  ;;  %p124_p2 = scmp.eq.s32.totalorder %s1038_s19, 1 }
   0x7   : > { %p129_p3 = scmp.ne.s32.totalorder %s980_s16, %s976_s15  ;;  %p130_p4 = scmp.eq.s32.totalorder %s795_s20, 1 }
   0x8   : > { %s1053_s24 = scalar_select %p111_p1, %s984_s17, %s113_s22  }
   0x9   : > { %p1055_p5 = por %p124_p2, %p123_p0  ;;  %p1059_p6 = por %p130_p4, %p129_p3 }
   0xa   : > { %p798_p7 = scmp.ge.s32.totalorder %s988_s18, 1  ;;  %p164_p8 = scmp.lt.s32.totalorder %s988_s18, 3 }
   0xc   : > { %p165_p9 = pnand %p798_p7, %p164_p8 }
   0xd   : > { %p188_p10 = scmp.lt.s32.totalorder (!%p165_p9), %s1038_s19, 1  ;;  %s186_s10 = sand.u32 (!%p165_p9), 1, %s980_s16  }
   0xe   : > { %168 = sbr.rel (%p165_p9) target bundleno = 989 (0x3dd), region = 36  ;;  %s736_s14 = scalar_lea.hbm (!%p165_p9), %s1313_s4, %s1038_s19 }
   0xf   : > { %s187_s20 = scalar_lea.vmem (!%p165_p9), [#allocation2], %s186_s10  ;;  %s740_s22 = sshll.u32 (!%p165_p9), %s736_s14, 4  ;;  %s741_s22 = int_to_ptr.hbm [resolvable:$true] %s740_s22 }
  0x10   : > { %s728_s23 = scalar_lea.sflag (!%p165_p9), [#allocation3], %s186_s10  ;;  %s940_s27 = sshra.s32 (!%p165_p9), %s741_s22, 4  ;;  %s941_s27 = int_to_ptr.hbm [resolvable:$true] %s940_s27 }
  0x11   : > { %s942_s28 = scalar_lea.hbm (!%p165_p9), %s941_s27, 1  ;;  %p947_p0 = scmp.lt.s32.totalorder (!%p165_p9), %s941_s27, %s1313_s4 }
  0x12   : > { %p943_p11 = scmp.ne.s32.totalorder (!%p165_p9), %s941_s27, %s942_s28 }
  0x13   : > { %v226_v0 = vld [vmem:[%s1311_s2 + $0x18] sm:$0xff]  ;;  %v195_v2 = vld [vmem:[%s1310_s1 + $0x8] sm:$0xff]  ;;  %v990_v3 = vmov 0   ;;  %s189_s7 = scalar_select %p188_p10, %s1038_s19, 1  ;;  %v196_v4 = vld [vmem:[%s1310_s1 + $0x10] sm:$0xff]  ;;  %v991_v6 = vmov 1  }
  0x14   : > { %v197_v1 = vld [vmem:[%s1310_s1 + $0x18] sm:$0xff]  ;;  %918 = vset.pattern.permute.xlu2 %v990_v3  ;;  %916 = vset.pattern.permute.xlu1 %v990_v3  ;;  %v225_v5 = vld [vmem:[%s1311_s2 + $0x10] sm:$0xff]  ;;  %v224_v7 = vld [vmem:[%s1311_s2 + $0x8] sm:$0xff]  ;;  %vm331_vm0 = vcmask 261120   ;;  %p944_p12 = pnand %p943_p11, %p1055_p5  ;;  %s946_s19 = scalar_lea.hbm %s1313_s4, 2 }
  0x15   : > { %915 = vset.pattern.permute.xlu0 %v990_v3  ;;  %244 = vperm.xlu1 %916, %v226_v0   ;;  %s799_s8 = sshll.u32 %s189_s7, 1  ;;  %v194_v8 = vld [vmem:[%s1310_s1] sm:$0xff]  ;;  %v806_v10 = vld [vmem:[%s1311_s2 + $0x30] sm:$0xff]  ;;  %v819_v11 = vld [vmem:[%s1311_s2 + $0x58] sm:$0xff]  ;;  %p948_p1 = scmp.lt.s32.totalorder %s946_s19, %s942_s28 }
  0x16   : > { %215 = vperm.xlu0 %915, %v197_v1   ;;  %205 = vperm.xlu2 %918, %v195_v2   ;;  %s1079_s11 = scalar_lea.vmem %s1309_s0, %s799_s8  ;;  %v223_v9 = vld [vmem:[%s1311_s2] sm:$0xff]  ;;  %v817_v12 = vld [vmem:[%s1311_s2 + $0x48] sm:$0xff]  ;;  %v830_v13 = vld [vmem:[%s1311_s2 + $0x70] sm:$0xff]  ;;  %p945_p13 = pneg %p944_p12 }
  0x17   : > { %v843_v14 = vld [vmem:[%s1311_s2 + $0x98] sm:$0xff]  ;;  %v840_v16 = vld [vmem:[%s1311_s2 + $0x80] sm:$0xff]  ;;  %v805_v17 = vld [vmem:[%s1311_s2 + $0x28] sm:$0xff]  ;;  %p949_p2 = por %p948_p1, %p947_p0 }
  0x18   : > { %v807_v15 = vld [vmem:[%s1311_s2 + $0x38] sm:$0xff]  ;;  %v854_v18 = vld [vmem:[%s1311_s2 + $0xb0] sm:$0xff]  ;;  %v690_v20 = vld [vmem:[%s1312_s3 + $0x8] sm:$0xff] }
  0x19   : > { %v818_v19 = vld [vmem:[%s1311_s2 + $0x50] sm:$0xff]  ;;  %v804_v21 = vld [vmem:[%s1311_s2 + $0x20] sm:$0xff]  ;;  %v831_v22 = vld [vmem:[%s1311_s2 + $0x78] sm:$0xff]  ;;  %p950_p3 = pnand %p949_p2, %p945_p13 }
  0x1a   : > { %v816_v23 = vld [vmem:[%s1311_s2 + $0x40] sm:$0xff]  ;;  %v829_v25 = vld [vmem:[%s1311_s2 + $0x68] sm:$0xff]  ;;  %v842_v30 = vld [vmem:[%s1311_s2 + $0x90] sm:$0xff] }
  0x1b   : > { %v828_v24 = vld [vmem:[%s1311_s2 + $0x60] sm:$0xff]  ;;  %v841_v26 = vld [vmem:[%s1311_s2 + $0x88] sm:$0xff]  ;;  %v855_v45 = vld [vmem:[%s1311_s2 + $0xb8] sm:$0xff] }
  0x1c   : > { %v853_v31 = vld [vmem:[%s1311_s2 + $0xa8] sm:$0xff]  ;;  %v1154_v32 = vld [vmem:[%s1079_s11] ss:$0 sm:$0xff]  ;;  %v1158_v34 = vld [vmem:[%s1079_s11 + $0x1] ss:$0 sm:$0xff]  ;;  %s738_s11 = sshll.u32 %s187_s20, 4  ;;  %s739_s11 = int_to_ptr.vmem [resolvable:$true] %s738_s11 }
  0x1d   : > { %917 = vset.pattern.permute.xlu1 %v991_v6  ;;  %v852_v37 = vld [vmem:[%s1311_s2 + $0xa0] sm:$0xff]  ;;  %v692_v46 = vld [vmem:[%s1312_s3 + $0x18] sm:$0xff]  ;;  %v691_v56 = vld [vmem:[%s1312_s3 + $0x10] sm:$0xff] }
  0x1e   : > { %210 = vperm.xlu0 %915, %v196_v4   ;;  %239 = vperm.xlu2 %918, %v225_v5   ;;  %v689_v38 = vld [vmem:[%s1312_s3] sm:$0xff]  ;;  %v803_v5 = vld [vmem:[%s1310_s1 + $0x38] sm:$0xff] }
  0x1f   : > { %264 = vperm.xlu1 %917, %v197_v1  }
  0x26   : > { %919 = vset.pattern.permute.xlu0 %v991_v6  ;;  %234 = vperm.xlu2 %918, %v224_v7   ;;  %v800_v7 = vld [vmem:[%s1310_s1 + $0x20] sm:$0xff] }
  0x27   : > { %920 = vset.pattern.permute.xlu1 %v990_v3  ;;  %260 = vperm.xlu0 %919, %v196_v4   ;;  %v802_v4 = vld [vmem:[%s1310_s1 + $0x30] sm:$0xff] }
  0x28   : > { %200 = vperm.xlu1 %920, %v194_v8  }
  0x2e   : > { %229 = vperm.xlu2 %918, %v223_v9  }
  0x2f   : > { %252 = vperm.xlu0 %919, %v194_v8   ;;  %v280_v8 = vlaneseq }
  0x30   : > { %921 = vset.pattern.permute.xlu1 %v991_v6  ;;  %v801_v6 = vld [vmem:[%s1310_s1 + $0x28] sm:$0xff] }
  0x31   : > { %256 = vperm.xlu1 %921, %v195_v2  }
  0x36   : > { %323 = vperm.xlu2 %918, %v806_v10   ;;  %v281_v10 = vshrl.u32 %v280_v8, 7 }
  0x37   : > { %923 = vset.pattern.permute.xlu0 %v990_v3 }
  0x38   : > { %313 = vperm.xlu0 %923, %v804_v21   ;;  %vm289_vm1 = vcmp.eq.s32.totalorder %v281_v10, 1  ;;  %vm285_vm2 = vcmp.eq.s32.totalorder %v281_v10, 0  ;;  %v837_v10 = vld [vmem:[%s1310_s1 + $0x88] sm:$0xff] }
  0x39   : > { %922 = vset.pattern.permute.xlu1 %v990_v3 }
  0x3a   : > { %328 = vperm.xlu1 %922, %v807_v15  }
  0x3e   : > { %408 = vperm.xlu2 %918, %v819_v11  }
  0x40   : > { %393 = vperm.xlu0 %923, %v816_v23  }
  0x42   : > { %318 = vperm.xlu1 %922, %v805_v17  }
  0x46   : > { %398 = vperm.xlu2 %918, %v817_v12  }
  0x48   : > { %473 = vperm.xlu0 %923, %v829_v25  }
  0x4a   : > { %403 = vperm.xlu1 %922, %v818_v19  }
  0x4e   : > { %478 = vperm.xlu2 %918, %v830_v13  }
  0x50   : > { %557 = vperm.xlu0 %923, %v842_v30   ;;  %v813_v30 = vld [vmem:[%s1310_s1 + $0x48] sm:$0xff] }
  0x52   : > { %483 = vperm.xlu1 %922, %v831_v22  }
  0x56   : > { %562 = vperm.xlu2 %918, %v843_v14  }
  0x58   : > { %622 = vperm.xlu0 %923, %v852_v37  }
  0x5a   : > { %468 = vperm.xlu1 %922, %v828_v24  }
  0x5e   : > { %547 = vperm.xlu2 %918, %v840_v16  }
  0x60   : > { %637 = vperm.xlu0 %923, %v855_v45  }
  0x62   : > { %552 = vperm.xlu1 %922, %v841_v26  }
  0x66   : > { %632 = vperm.xlu2 %918, %v854_v18  }
  0x68   : > { %705 = vperm.xlu0 %923, %v691_v56  }
  0x6a   : > { %627 = vperm.xlu1 %922, %v853_v31   ;;  %v814_v31 = vld [vmem:[%s1310_s1 + $0x50] sm:$0xff] }
  0x6e   : > { %700 = vperm.xlu2 %918, %v690_v20   ;;  %v293_v20 = vsel %vm289_vm1, %v1158_v34, 0.0 }
  0x6f   : > { %v297_v25 = vsel %vm285_vm2, %v1154_v32, %v293_v20 }
  0x70   : > { %v206_v27 = vpop.permute.xlu2 %205 }
  0x71   : > { %v220_v54 = vmul.f32 %v1154_v32, %v206_v27 }
  0x72   : > { %695 = vperm.xlu1 %922, %v689_v38  }
  0x78   : > { %v240_v35 = vpop.permute.xlu2 %239 }
  0x7a   : > { %710 = vperm.xlu1 %922, %v692_v46  }
  0x80   : > { %v235_v47 = vpop.permute.xlu2 %234 }
  0x81   : > { %v248_v61 = vadd.f32 %v235_v47, %v220_v54 }
  0x87   : > { %v245_v28 = vpop.permute.xlu1 %244 }
  0x88   : > { %v216_v29 = vpop.permute.xlu0 %215  ;;  %v230_v59 = vpop.permute.xlu2 %229 }
  0x89   : > { %v222_v33 = vmul.f32 %v1154_v32, %v216_v29  ;;  %v812_v29 = vld [vmem:[%s1310_s1 + $0x40] sm:$0xff] }
  0x8b   : > { %v250_v40 = vadd.f32 %v245_v28, %v222_v33 }
  0x90   : > { %v211_v36 = vpop.permute.xlu0 %210  ;;  %v324_v13 = vpop.permute.xlu2 %323 }
  0x91   : > { %v265_v39 = vpop.permute.xlu1 %264  ;;  %v221_v43 = vmul.f32 %v1154_v32, %v211_v36 }
  0x92   : > { %v271_v41 = vmul.f32 %v1158_v34, %v265_v39 }
  0x93   : > { %v249_v49 = vadd.f32 %v240_v35, %v221_v43 }
  0x94   : > { %v275_v42 = vadd.f32 %v271_v41, %v250_v40 }
  0x96   : > { %v279_v44 = vmax.f32 %v275_v42, 0.0 }
  0x98   : > { %356 = vmatpush.msra.mxu0 %v279_v44  ;;  %862 = vmatpush.msra.mxu1 %v279_v44  ;;  %v409_v35 = vpop.permute.xlu2 %408 }
  0x99   : > { %863 = vmatpush.msra.mxu2 %v279_v44  ;;  %864 = vmatpush.msra.mxu3 %v279_v44  ;;  %v261_v48 = vpop.permute.xlu0 %260 }
  0x9a   : > { %v270_v50 = vmul.f32 %v1158_v34, %v261_v48  ;;  %v201_v51 = vpop.permute.xlu1 %200 }
  0x9b   : > { %v219_v55 = vmul.f32 %v1154_v32, %v201_v51  ;;  %v815_v32 = vld [vmem:[%s1310_s1 + $0x58] sm:$0xff]  ;;  %v826_v51 = vld [vmem:[%s1310_s1 + $0x70] sm:$0xff] }
  0x9c   : > { %v274_v52 = vadd.f32 %v270_v50, %v249_v49  ;;  %v824_v49 = vld [vmem:[%s1310_s1 + $0x60] sm:$0xff]  ;;  %v825_v50 = vld [vmem:[%s1310_s1 + $0x68] sm:$0xff] }
  0x9d   : > { %v247_v62 = vadd.f32 %v230_v59, %v219_v55 }
  0x9e   : > { %v278_v53 = vmax.f32 %v274_v52, 0.0  ;;  %v827_v52 = vld [vmem:[%s1310_s1 + $0x78] sm:$0xff] }
  0xa0   : > { %357 = vmatpush.msra.mxu0 %v278_v53  ;;  %865 = vmatpush.msra.mxu1 %v278_v53  ;;  %v399_v41 = vpop.permute.xlu2 %398 }
  0xa1   : > { %866 = vmatpush.msra.mxu2 %v278_v53  ;;  %867 = vmatpush.msra.mxu3 %v278_v53  ;;  %v253_v57 = vpop.permute.xlu0 %252 }
  0xa2   : > { %v268_v58 = vmul.f32 %v1158_v34, %v253_v57 }
  0xa3   : > { %v257_v60 = vpop.permute.xlu1 %256 }
  0xa4   : > { %v269_v63 = vmul.f32 %v1158_v34, %v257_v60  ;;  %v272_v0 = vadd.f32 %v268_v58, %v247_v62 }
  0xa6   : > { %v273_v1 = vadd.f32 %v269_v63, %v248_v61  ;;  %v276_v3 = vmax.f32 %v272_v0, 0.0 }
  0xa8   : > { %v277_v2 = vmax.f32 %v273_v1, 0.0  ;;  %v479_v57 = vpop.permute.xlu2 %478 }
  0xaa   : > { %358 = vmatpush.msra.mxu0 %v277_v2  ;;  %868 = vmatpush.msra.mxu1 %v277_v2  ;;  %v314_v12 = vpop.permute.xlu0 %313 }
  0xab   : > { %869 = vmatpush.msra.mxu2 %v277_v2  ;;  %870 = vmatpush.msra.mxu3 %v277_v2 }
  0xac   : > { %359 = vmatpush.msra.mxu0 %v276_v3  ;;  %871 = vmatpush.msra.mxu1 %v276_v3  ;;  %v329_v9 = vpop.permute.xlu1 %328 }
  0xad   : > { %872 = vmatpush.msra.mxu2 %v276_v3  ;;  %873 = vmatpush.msra.mxu3 %v276_v3 }
  0xae   : > { %810 = vmatmul.msk.f32.vlgmr.msra.gmra.mxu2 %vm331_vm0, %v802_v4  ;;  %811 = vmatmul.msk.f32.vlgmr.msra.gmra.mxu3 %vm331_vm0, %v803_v5 }
  0xaf   : > { %809 = vmatmul.msk.f32.vlgmr.msra.gmra.mxu1 %vm331_vm0, %v801_v6  ;;  %808 = vmatmul.msk.f32.vlgmr.msra.gmra.mxu0 %vm331_vm0, %v800_v7 }
  0xb2   : > { %v394_v44 = vpop.permute.xlu0 %393 }
  0xb4   : > { %v319_v21 = vpop.permute.xlu1 %318 }
  0xba   : > { %v474_v59 = vpop.permute.xlu0 %473 }
  0xbc   : > { %v404_v37 = vpop.permute.xlu1 %403 }
  0xc4   : > { %v484_v55 = vpop.permute.xlu1 %483 }
  0xcc   : > { %v469_v63 = vpop.permute.xlu1 %468 }
 0x12c   : > { %v361_v11 = vpop.f32.mrf.mxu0  ;;  %v364_v14 = vpop.f32.mrf.mxu1 }
 0x12d   : > { %v362_v15 = vadd.f32 %v361_v11, %v314_v12  ;;  %v1203_v22 = vadd.f32 %v364_v14, %v319_v21  ;;  %v838_v11 = vld [vmem:[%s1310_s1 + $0x90] sm:$0xff]  ;;  %v839_v12 = vld [vmem:[%s1310_s1 + $0x98] sm:$0xff]  ;;  %v553_v21 = vpop.permute.xlu1 %552 }
 0x12f   : > { %v373_v24 = vmax.f32 %v362_v15, 0.0  ;;  %v374_v27 = vmax.f32 %v1203_v22, 0.0 }
 0x131   : > { %v367_v16 = vpop.f32.mrf.mxu2  ;;  %v370_v17 = vpop.f32.mrf.mxu3  ;;  %v377_v28 = vadd.f32 %v373_v24, %v297_v25 }
 0x132   : > { %v1198_v18 = vadd.f32 %v367_v16, %v324_v13  ;;  %v1200_v19 = vadd.f32 %v370_v17, %v329_v9  ;;  %v836_v9 = vld [vmem:[%s1310_s1 + $0x80] sm:$0xff]  ;;  %v563_v16 = vpop.permute.xlu2 %562  ;;  %v558_v17 = vpop.permute.xlu0 %557 }
 0x134   : > { %v376_v23 = vmax.f32 %v1200_v19, 0.0  ;;  %v375_v26 = vmax.f32 %v1198_v18, 0.0 }
 0x136   : > { %435 = vmatpush.msrb.mxu1 %v376_v23 }
 0x138   : > { %436 = vmatpush.msrb.mxu1 %v375_v26 }
 0x13a   : > { %437 = vmatpush.msrb.mxu1 %v374_v27  ;;  %v548_v24 = vpop.permute.xlu2 %547 }
 0x13c   : > { %438 = vmatpush.msrb.mxu1 %v377_v28 }
 0x13d   : > { %820 = vmatmul.msk.f32.vlgmr.msrb.gmra.mxu1 %vm331_vm0, %v812_v29  ;;  %v848_v29 = vld [vmem:[%s1310_s1 + $0xa0] sm:$0xff] }
 0x145   : > { %821 = vmatmul.msk.f32.gmra.mxu1 %vm331_vm0, %v813_v30  ;;  %v849_v30 = vld [vmem:[%s1310_s1 + $0xa8] sm:$0xff] }
 0x14d   : > { %822 = vmatmul.msk.f32.gmra.mxu1 %vm331_vm0, %v814_v31  ;;  %v850_v31 = vld [vmem:[%s1310_s1 + $0xb0] sm:$0xff] }
 0x155   : > { %823 = vmatmul.msk.f32.gmra.mxu1 %vm331_vm0, %v815_v32  ;;  %v851_v32 = vld [vmem:[%s1310_s1 + $0xb8] sm:$0xff] }
 0x1ba   : > { %v440_v33 = vpop.f32.mrf.mxu1 }
 0x1bb   : > { %v441_v45 = vadd.f32 %v440_v33, %v394_v44 }
 0x1bd   : > { %v452_v48 = vmax.f32 %v441_v45, 0.0 }
 0x1c2   : > { %v443_v34 = vpop.f32.mrf.mxu1 }
 0x1c3   : > { %v444_v42 = vadd.f32 %v443_v34, %v399_v41  ;;  %v623_v34 = vpop.permute.xlu0 %622 }
 0x1c5   : > { %v453_v47 = vmax.f32 %v444_v42, 0.0 }
 0x1ca   : > { %v446_v36 = vpop.f32.mrf.mxu1 }
 0x1cb   : > { %v447_v39 = vadd.f32 %v446_v36, %v404_v37  ;;  %v628_v36 = vpop.permute.xlu1 %627 }
 0x1cd   : > { %v454_v46 = vmax.f32 %v447_v39, 0.0 }
 0x1d2   : > { %v449_v38 = vpop.f32.mrf.mxu1 }
 0x1d3   : > { %v450_v40 = vadd.f32 %v449_v38, %v409_v35  ;;  %v633_v38 = vpop.permute.xlu2 %632 }
 0x1d5   : > { %v455_v43 = vmax.f32 %v450_v40, 0.0  ;;  %v638_v40 = vpop.permute.xlu0 %637 }
 0x1d7   : > { %510 = vmatpush.msrb.mxu2 %v455_v43 }
 0x1d9   : > { %511 = vmatpush.msrb.mxu2 %v454_v46  ;;  %v696_v46 = vpop.permute.xlu1 %695 }
 0x1db   : > { %512 = vmatpush.msrb.mxu2 %v453_v47 }
 0x1dd   : > { %513 = vmatpush.msrb.mxu2 %v452_v48 }
 0x1de   : > { %832 = vmatmul.msk.f32.vlgmr.msrb.gmra.mxu2 %vm331_vm0, %v824_v49 }
 0x1e6   : > { %833 = vmatmul.msk.f32.gmra.mxu2 %vm331_vm0, %v825_v50  ;;  %v701_v50 = vpop.permute.xlu2 %700 }
 0x1ee   : > { %834 = vmatmul.msk.f32.gmra.mxu2 %vm331_vm0, %v826_v51 }
 0x1f6   : > { %835 = vmatmul.msk.f32.gmra.mxu2 %vm331_vm0, %v827_v52 }
 0x261   : > { %v515_v53 = vpop.f32.mrf.mxu2 }
 0x262   : > { %v516_v0 = vadd.f32 %v515_v53, %v469_v63 }
 0x264   : > { %v527_v5 = vmax.f32 %v516_v0, 0.0 }
 0x266   : > { %v531_v8 = vadd.f32 %v527_v5, %v377_v28 }
 0x269   : > { %v518_v54 = vpop.f32.mrf.mxu2 }
 0x26a   : > { %v519_v61 = vadd.f32 %v518_v54, %v474_v59  ;;  %v706_v54 = vpop.permute.xlu0 %705 }
 0x26c   : > { %v528_v3 = vmax.f32 %v519_v61, 0.0 }
 0x26e   : > { %v532_v7 = vadd.f32 %v528_v3, %v374_v27 }
 0x271   : > { %v521_v56 = vpop.f32.mrf.mxu2 }
 0x272   : > { %v522_v58 = vadd.f32 %v521_v56, %v479_v57 }
 0x274   : > { %v529_v1 = vmax.f32 %v522_v58, 0.0 }
 0x276   : > { %v533_v6 = vadd.f32 %v529_v1, %v375_v26 }
 0x279   : > { %v524_v60 = vpop.f32.mrf.mxu2 }
 0x27a   : > { %v525_v62 = vadd.f32 %v524_v60, %v484_v55  ;;  %v711_v60 = vpop.permute.xlu1 %710 }
 0x27c   : > { %v530_v2 = vmax.f32 %v525_v62, 0.0 }
 0x27e   : > { %v1241_v4 = vadd.f32 %v530_v2, %v376_v23 }
 0x280   : > { %589 = vmatpush.msrb.mxu3 %v1241_v4 }
 0x282   : > { %590 = vmatpush.msrb.mxu3 %v533_v6 }
 0x284   : > { %591 = vmatpush.msrb.mxu3 %v532_v7 }
 0x286   : > { %592 = vmatpush.msrb.mxu3 %v531_v8 }
 0x287   : > { %844 = vmatmul.msk.f32.vlgmr.msrb.gmra.mxu3 %vm331_vm0, %v836_v9 }
 0x28f   : > { %845 = vmatmul.msk.f32.gmra.mxu3 %vm331_vm0, %v837_v10 }
 0x297   : > { %846 = vmatmul.msk.f32.gmra.mxu3 %vm331_vm0, %v838_v11 }
 0x29f   : > { %847 = vmatmul.msk.f32.gmra.mxu3 %vm331_vm0, %v839_v12 }
 0x30a   : > { %v594_v13 = vpop.f32.mrf.mxu3 }
 0x30b   : > { %v595_v25 = vadd.f32 %v594_v13, %v548_v24 }
 0x30d   : > { %v606_v28 = vmax.f32 %v595_v25, 0.0 }
 0x312   : > { %v597_v14 = vpop.f32.mrf.mxu3 }
 0x313   : > { %v598_v22 = vadd.f32 %v597_v14, %v553_v21 }
 0x315   : > { %v607_v27 = vmax.f32 %v598_v22, 0.0 }
 0x31a   : > { %v600_v15 = vpop.f32.mrf.mxu3 }
 0x31b   : > { %v601_v19 = vadd.f32 %v600_v15, %v558_v17 }
 0x31d   : > { %v608_v26 = vmax.f32 %v601_v19, 0.0 }
 0x322   : > { %v603_v18 = vpop.f32.mrf.mxu3 }
 0x323   : > { %v604_v20 = vadd.f32 %v603_v18, %v563_v16 }
 0x325   : > { %v609_v23 = vmax.f32 %v604_v20, 0.0 }
 0x327   : > { %664 = vmatpush.msrb.mxu0 %v609_v23 }
 0x329   : > { %665 = vmatpush.msrb.mxu0 %v608_v26 }
 0x32b   : > { %666 = vmatpush.msrb.mxu0 %v607_v27 }
 0x32d   : > { %667 = vmatpush.msrb.mxu0 %v606_v28 }
 0x32e   : > { %856 = vmatmul.msk.f32.vlgmr.msrb.gmra.mxu0 %vm331_vm0, %v848_v29 }
 0x336   : > { %857 = vmatmul.msk.f32.gmra.mxu0 %vm331_vm0, %v849_v30 }
 0x33e   : > { %858 = vmatmul.msk.f32.gmra.mxu0 %vm331_vm0, %v850_v31 }
 0x346   : > { %859 = vmatmul.msk.f32.gmra.mxu0 %vm331_vm0, %v851_v32 }
 0x3ab   : > { %v669_v33 = vpop.f32.mrf.mxu0 }
 0x3ac   : > { %v670_v39 = vadd.f32 %v669_v33, %v623_v34 }
 0x3ae   : > { %v681_v44 = vmax.f32 %v670_v39, 0.0 }
 0x3b0   : > { %v685_v48 = vadd.f32 %v681_v44, %v531_v8 }
 0x3b2   : > { %v713_v55 = vmul.f32 %v696_v46, %v685_v48 }
 0x3b3   : > { %v672_v35 = vpop.f32.mrf.mxu0 }
 0x3b4   : > { %v673_v37 = vadd.f32 %v672_v35, %v628_v36 }
 0x3b6   : > { %v682_v42 = vmax.f32 %v673_v37, 0.0 }
 0x3b8   : > { %v686_v47 = vadd.f32 %v682_v42, %v532_v7 }
 0x3ba   : > { %v714_v52 = vmul.f32 %v701_v50, %v686_v47 }
 0x3bb   : > { %v675_v41 = vpop.f32.mrf.mxu0 }
 0x3bc   : > { %v676_v43 = vadd.f32 %v675_v41, %v633_v38  ;;  %v717_v58 = vadd.f32 %v714_v52, %v713_v55 }
 0x3be   : > { %v683_v45 = vmax.f32 %v676_v43, 0.0 }
 0x3c0   : > { %v687_v49 = vadd.f32 %v683_v45, %v533_v6 }
 0x3c2   : > { %v715_v56 = vmul.f32 %v706_v54, %v687_v49 }
 0x3c3   : > { %v678_v51 = vpop.f32.mrf.mxu0 }
 0x3c4   : > { %v679_v53 = vadd.f32 %v678_v51, %v638_v40  ;;  %v718_v61 = vadd.f32 %v717_v58, %v715_v56 }
 0x3c6   : > { %v684_v57 = vmax.f32 %v679_v53, 0.0 }
 0x3c8   : > { %v688_v59 = vadd.f32 %v684_v57, %v1241_v4 }
 0x3ca   : > { %v716_v62 = vmul.f32 %v711_v60, %v688_v59 }
 0x3cc   : > { %v719_v63 = vadd.f32 %v718_v61, %v716_v62 }
 0x3ce   : > { %v720_v0 = vrot.slane %v719_v63, 4 }
 0x3d0   : > { %v721_v1 = vadd.f32 %v720_v0, %v719_v63 }
 0x3d2   : > { %v722_v2 = vrot.slane %v721_v1, 2 }
 0x3d4   : > { %v723_v3 = vadd.f32 %v722_v2, %v721_v1 }
 0x3d6   : > { %v724_v5 = vrot.slane %v723_v3, 1 }
 0x3d8   : > { %v725_v6 = vadd.f32 %v724_v5, %v723_v3 }
 0x3da   : > { %726 = vst [vmem:[%s187_s20] sm:$0x1] %v725_v6 }
 0x3db   : > { %953 = shalt.err (!%p950_p3)
}
 0x3dc   : > { %874 = dma.vmem_to_hbm [thread:$0]  (%p1055_p5), %s739_s11, 16, %s741_s22, %s728_s23  }
 0x3dd PF: > { %p880_p4 = scmp.ge.s32.totalorder %s988_s18, 2  ;;  %s752_s7 = sand.u32 1, %s976_s15  }
 0x3de   : > { %s753_s8 = scalar_lea.sflag [#allocation3], %s752_s7 }
 0x3df   : > { %p877_p7 = pnand %p880_p4, %p1059_p6 }
 0x3e1   : > { %p878_p8 = pneg %p877_p7 }
 0x3e3   : > { %971 = dma.done.wait (%p878_p8), %s753_s8, 16  }
 0x3e4   : > { %973 = vsyncadd (%p878_p8), %s753_s8, 4294967280  ;;  %p14_p9 = scmp.ge.s32.totalorder %s1042_s21, 4   ;;  %s1316_s15 = smov %s980_s16 }
 0x3e5   : > { %s1317_s16 = smov %s984_s17  ;;  %s1318_s17 = smov %s1053_s24 }
 0x3e6   : > { %s1319_s18 = smov %s1042_s21  ;;  %16 = sbr.rel (!%p14_p9) target bundleno = 3 (0x3), region = 81 }
 0x3eb   :  { %758 = vsyncpa [#allocation3], 1 }
 0x3ec   :  { %760 = vsyncpa [#allocation3 + $0x1], 1 }

</bundles_post_ra>
